<compile_context>
chip_gen: v5e
topology: v5e:2x2
jax: 0.10.0
libtpu: 0.0.40
codegen_flags: <defaults>
</compile_context>

<pallas_src>
import functools

import jax
import jax.numpy as jnp
from jax.experimental import pallas as pl
from jax.experimental.pallas import tpu as pltpu


# ------------------------------ Pallas kernel --------------------------------
def _linear_kernel(x_ref, w_ref, b_ref, o_ref, acc_ref, *, apply_relu: bool):
    """One (tm, tn) output tile of y = relu?(x @ w + b), accumulated over K tiles.

    x_ref : [tm, tk]  bf16   w_ref : [tk, tn] bf16   b_ref : [1, tn] f32
    o_ref : [tm, tn]  (bf16 for hidden layers, f32 for the last)
    acc_ref: [tm, tn] f32 VMEM scratch, persistent across the K grid axis.
    """
    k = pl.program_id(2)

    @pl.when(k == 0)
    def _init():
        acc_ref[...] = jnp.zeros_like(acc_ref)

    # bf16 x bf16 -> f32 accumulate on the MXU (no operand transpose needed).
    acc_ref[...] += jnp.dot(x_ref[...], w_ref[...],
                            preferred_element_type=jnp.float32)

    @pl.when(k == pl.num_programs(2) - 1)
    def _store():
        out = acc_ref[...] + b_ref[...]          # f32 bias-add
        if apply_relu:
            out = jnp.maximum(out, 0.0)          # f32 ReLU epilogue
        o_ref[...] = out.astype(o_ref.dtype)


# ------------------------------- helpers --------------------------------------
def _round_up(n: int, m: int) -> int:
    return ((n + m - 1) // m) * m


def _pick_tile(dim_pad: int, candidates) -> int:
    """Largest candidate tile that evenly divides the padded dim."""
    for c in candidates:
        if c <= dim_pad and dim_pad % c == 0:
            return c
    return dim_pad


def _linear_layer(h, w_t, b_p, *, apply_relu: bool, out_dtype):
    """Tiled pallas_call for one padded Linear layer. h:[M,K] bf16, w_t:[K,N] bf16."""
    m_pad, k_pad = h.shape
    _, n_pad = w_t.shape

    tm = _pick_tile(m_pad, (256, 128, 64, 32, 16, 8))
    tn = _pick_tile(n_pad, (256, 128))            # v6e/v7x MXU-aligned when possible
    tk = _pick_tile(k_pad, (512, 256, 128))
    grid = (m_pad // tm, n_pad // tn, k_pad // tk)

    # Deeper weight buffering only when the K axis is deep enough to benefit.
    if grid[2] >= 3:
        w_spec = pl.BlockSpec((tk, tn), lambda i, j, k: (k, j),
                              pipeline_mode=pl.Buffered(3))
    else:
        w_spec = pl.BlockSpec((tk, tn), lambda i, j, k: (k, j))

    flops = 2 * m_pad * n_pad * k_pad
    bytes_accessed = int(m_pad * k_pad * 2 + k_pad * n_pad * 2 + n_pad * 4
                         + m_pad * n_pad * jnp.dtype(out_dtype).itemsize)

    return pl.pallas_call(
        functools.partial(_linear_kernel, apply_relu=apply_relu),
        out_shape=jax.ShapeDtypeStruct((m_pad, n_pad), out_dtype),
        grid_spec=pltpu.PrefetchScalarGridSpec(
            num_scalar_prefetch=0,
            grid=grid,
            in_specs=[
                pl.BlockSpec((tm, tk), lambda i, j, k: (i, k)),
                w_spec,
                pl.BlockSpec((1, tn), lambda i, j, k: (0, j)),
            ],
            out_specs=pl.BlockSpec((tm, tn), lambda i, j, k: (i, j)),
            scratch_shapes=[pltpu.VMEM((tm, tn), jnp.float32)],
        ),
        compiler_params=pltpu.CompilerParams(
            dimension_semantics=("parallel", "parallel", "arbitrary"),
            vmem_limit_bytes=32 * 1024 * 1024,
        ),
        cost_estimate=pl.CostEstimate(flops=flops, transcendentals=0,
                                      bytes_accessed=bytes_accessed),
    )(h, w_t, b_p)


# --------------------------- one-time param prep --------------------------------
def prepare_mlp_params(params, input_size):
    """Hoisted out of the hot path: transpose to [in, out], zero-pad features to
    multiples of 128 lanes, cast weights to bf16 (bias stays f32)."""
    prepped = []
    cur_in, cur_in_pad = input_size, _round_up(input_size, 128)
    for w, b in params:
        out_f = w.shape[0]
        out_pad = _round_up(out_f, 128)
        w_t = jnp.zeros((cur_in_pad, out_pad), jnp.bfloat16)
        w_t = w_t.at[:cur_in, :out_f].set(w.T.astype(jnp.bfloat16))
        b_p = jnp.zeros((1, out_pad), jnp.float32)
        b_p = b_p.at[0, :out_f].set(b.astype(jnp.float32))
        prepped.append((w_t, b_p))
        cur_in, cur_in_pad = out_f, out_pad
    return tuple(prepped)


# ------------------------------- jitted forward ---------------------------------
@functools.partial(jax.jit, static_argnames=("input_size", "num_classes"))
def mlp_forward(x, prepped, *, input_size, num_classes):
    """Flatten -> (Linear+ReLU)*(L-1) -> Linear.  Pad, L pallas_calls, crop: one dispatch."""
    batch = x.shape[0]
    x2d = x.reshape(batch, input_size)           # x.view(x.size(0), input_size)

    in_pad = prepped[0][0].shape[0]
    b_pad = _round_up(max(batch, 1), 16)         # bf16 packs 16 rows/vreg along sublanes
    h = jnp.zeros((b_pad, in_pad), jnp.bfloat16)
    h = h.at[:batch, :input_size].set(x2d.astype(jnp.bfloat16))

    n_layers = len(prepped)
    for i, (w_t, b_p) in enumerate(prepped):
        last = (i == n_layers - 1)
        h = _linear_layer(h, w_t, b_p,
                          apply_relu=not last,
                          out_dtype=jnp.float32 if last else jnp.bfloat16)

    # Crop the lane/sublane padding back to the logical shape.
    return h[:batch, :num_classes]


# ------------------------------- params init ----------------------------------
def init_mlp_params(key, input_size, num_classes, layers=(), dtype=jnp.float32):
    """Matches torch nn.Linear shapes: fc_i = Linear(insizes[i], outsizes[i])."""
    insizes = [input_size] + list(layers)
    outsizes = list(layers) + [num_classes]
    params = []
    for insize, outsize in zip(insizes, outsizes):
        key, kw, kb = jax.random.split(key, 3)
        bound = 1.0 / (insize ** 0.5)            # torch.nn.Linear default init range
        w = jax.random.uniform(kw, (outsize, insize), dtype, -bound, bound)
        b = jax.random.uniform(kb, (outsize,), dtype, -bound, bound)
        params.append((w, b))
    return params


# ----------------------------------- main --------------------------------------
if __name__ == "__main__":
    key = jax.random.PRNGKey(0)
    k_x, k_p = jax.random.split(key)

    # Small shapes: batch=2, channels=4, spatial=4 -> input_size = 4*4*4 = 64
    B, C, H, W = 2, 4, 4, 4
    input_size = C * H * W
    num_classes = 10
    hidden_layers = (32, 32)

    x = jax.random.normal(k_x, (B, C, H, W), dtype=jnp.float32)
    params = init_mlp_params(k_p, input_size, num_classes, hidden_layers)

    # One-time weight prep (transpose + pad + bf16 cast) outside the hot path.
    prepped = prepare_mlp_params(params, input_size)

    out = mlp_forward(x, prepped, input_size=input_size, num_classes=num_classes)
    out = jax.block_until_ready(out)

    # Reference with identical numerics (bf16 dot inputs, f32 accum/bias/ReLU).
    ref = x.reshape(B, input_size).astype(jnp.float32)
    for i, (w, b) in enumerate(params):
        ref = jnp.dot(ref.astype(jnp.bfloat16), w.T.astype(jnp.bfloat16),
                      preferred_element_type=jnp.float32) + b.astype(jnp.float32)
        if i < len(params) - 1:
            ref = jnp.maximum(ref, 0.0)

    assert out.shape == (B, num_classes)
    assert out.dtype == jnp.float32
    assert jnp.allclose(out, ref, atol=1e-4, rtol=1e-4), float(jnp.max(jnp.abs(out - ref)))

    # Looser sanity check vs the pure-f32 PyTorch-semantics reference
    # (bf16 weights introduce small, bounded drift).
    ref32 = x.reshape(B, input_size)
    for i, (w, b) in enumerate(params):
        ref32 = ref32 @ w.T + b
        if i < len(params) - 1:
            ref32 = jnp.maximum(ref32, 0.0)
    assert jnp.allclose(out, ref32, atol=0.2, rtol=0.1)

    print("KERNEL_OK")
</pallas_src>

<mosaic_0001>
module attributes {stable_mosaic.version = 11 : i64} {
  func.func @_linear_kernel(%arg0: i32, %arg1: i32, %arg2: i32, %arg3: memref<16x128xbf16, #tpu.memory_space<vmem>>, %arg4: memref<128x128xbf16, #tpu.memory_space<vmem>>, %arg5: memref<1x128xf32, #tpu.memory_space<vmem>>, %arg6: memref<16x128xbf16, #tpu.memory_space<vmem>>, %arg7: memref<16x128xf32, #tpu.memory_space<vmem>>) attributes {dimension_semantics = [#tpu.dimension_semantics<parallel>, #tpu.dimension_semantics<parallel>, #tpu.dimension_semantics<arbitrary>], iteration_bounds = array<i64: 1, 1, 1>, scalar_prefetch = 0 : i64, scratch_operands = 1 : i64, tpu.core_type = #tpu.core_type<tc>, window_params = [{transform_indices = @transform_0, window_bounds = array<i64: 16, 128>}, {transform_indices = @transform_1, window_bounds = array<i64: 128, 128>}, {transform_indices = @transform_2, window_bounds = array<i64: 1, 128>}, {transform_indices = @transform_3, window_bounds = array<i64: 16, 128>}]} {
    %c0_i32 = arith.constant 0 : i32
    %0 = arith.cmpi eq, %arg2, %c0_i32 : i32
    %1 = arith.extui %0 : i1 to i32
    %c0_i32_0 = arith.constant 0 : i32
    %2 = arith.cmpi ne, %1, %c0_i32_0 : i32
    scf.if %2 {
      %cst_10 = arith.constant 0.000000e+00 : f32
      %12 = vector.broadcast %cst_10 : f32 to vector<16x128xf32>
      %c0_11 = arith.constant 0 : index
      %c0_12 = arith.constant 0 : index
      %13 = vector.load %arg7[%c0_11, %c0_12] : memref<16x128xf32, #tpu.memory_space<vmem>>, vector<16x128xf32>
      tpu.vector_store %arg7[%c0_11, %c0_12], %12 {strides = array<i32>} : memref<16x128xf32, #tpu.memory_space<vmem>>, vector<16x128xf32>,
    } else {
    }
    %c0 = arith.constant 0 : index
    %c0_1 = arith.constant 0 : index
    %3 = vector.load %arg7[%c0, %c0_1] : memref<16x128xf32, #tpu.memory_space<vmem>>, vector<16x128xf32>
    %c0_2 = arith.constant 0 : index
    %c0_3 = arith.constant 0 : index
    %4 = vector.load %arg3[%c0_2, %c0_3] : memref<16x128xbf16, #tpu.memory_space<vmem>>, vector<16x128xbf16>
    %c0_4 = arith.constant 0 : index
    %c0_5 = arith.constant 0 : index
    %5 = vector.load %arg4[%c0_4, %c0_5] : memref<128x128xbf16, #tpu.memory_space<vmem>>, vector<128x128xbf16>
    %cst = arith.constant dense<0.000000e+00> : vector<16x128xf32>
    %6 = tpu.matmul %4, %5, %cst {dimension_numbers = #tpu.dot_dimension_numbers<[1], [0], [0], [1], [0, 0, 1, 1], [], []>} : vector<16x128xbf16>, vector<128x128xbf16>, vector<16x128xf32> -> vector<16x128xf32>
    %7 = arith.addf %3, %6 : vector<16x128xf32>
    %c0_6 = arith.constant 0 : index
    %c0_7 = arith.constant 0 : index
    %8 = vector.load %arg7[%c0_6, %c0_7] : memref<16x128xf32, #tpu.memory_space<vmem>>, vector<16x128xf32>
    tpu.vector_store %arg7[%c0_6, %c0_7], %7 {strides = array<i32>} : memref<16x128xf32, #tpu.memory_space<vmem>>, vector<16x128xf32>,
    %c0_i32_8 = arith.constant 0 : i32
    %9 = arith.cmpi eq, %arg2, %c0_i32_8 : i32
    %10 = arith.extui %9 : i1 to i32
    %c0_i32_9 = arith.constant 0 : i32
    %11 = arith.cmpi ne, %10, %c0_i32_9 : i32
    scf.if %11 {
      %c0_10 = arith.constant 0 : index
      %c0_11 = arith.constant 0 : index
      %12 = vector.load %arg7[%c0_10, %c0_11] : memref<16x128xf32, #tpu.memory_space<vmem>>, vector<16x128xf32>
      %c0_12 = arith.constant 0 : index
      %c0_13 = arith.constant 0 : index
      %13 = vector.load %arg5[%c0_12, %c0_13] : memref<1x128xf32, #tpu.memory_space<vmem>>, vector<1x128xf32>
      %14 = vector.broadcast %13 : vector<1x128xf32> to vector<16x128xf32>
      %15 = arith.addf %12, %14 : vector<16x128xf32>
      %cst_14 = arith.constant 0.000000e+00 : f32
      %16 = vector.broadcast %cst_14 : f32 to vector<16x128xf32>
      %17 = arith.maximumf %15, %16 : vector<16x128xf32>
      %18 = arith.truncf %17 : vector<16x128xf32> to vector<16x128xbf16>
      %c0_15 = arith.constant 0 : index
      %c0_16 = arith.constant 0 : index
      %19 = vector.load %arg6[%c0_15, %c0_16] : memref<16x128xbf16, #tpu.memory_space<vmem>>, vector<16x128xbf16>
      tpu.vector_store %arg6[%c0_15, %c0_16], %18 {strides = array<i32>} : memref<16x128xbf16, #tpu.memory_space<vmem>>, vector<16x128xbf16>,
    } else {
    }
    return
  }
  func.func @transform_0(%arg0: i32, %arg1: i32, %arg2: i32) -> (i32, i32) {
    %c0_i32 = arith.constant 0 : i32
    return %arg0, %arg2 : i32, i32
  }
  func.func @transform_1(%arg0: i32, %arg1: i32, %arg2: i32) -> (i32, i32) {
    %c0_i32 = arith.constant 0 : i32
    return %arg2, %arg1 : i32, i32
  }
  func.func @transform_2(%arg0: i32, %arg1: i32, %arg2: i32) -> (i32, i32) {
    %c0_i32 = arith.constant 0 : i32
    %c0_i32_0 = arith.constant 0 : i32
    return %c0_i32, %arg1 : i32, i32
  }
  func.func @transform_3(%arg0: i32, %arg1: i32, %arg2: i32) -> (i32, i32) {
    %c0_i32 = arith.constant 0 : i32
    return %arg0, %arg1 : i32, i32
  }
}

module attributes {stable_mosaic.version = 11 : i64} {
  func.func @_linear_kernel(%arg0: i32, %arg1: i32, %arg2: i32, %arg3: memref<16x128xbf16, #tpu.memory_space<vmem>>, %arg4: memref<128x128xbf16, #tpu.memory_space<vmem>>, %arg5: memref<1x128xf32, #tpu.memory_space<vmem>>, %arg6: memref<16x128xf32, #tpu.memory_space<vmem>>, %arg7: memref<16x128xf32, #tpu.memory_space<vmem>>) attributes {dimension_semantics = [#tpu.dimension_semantics<parallel>, #tpu.dimension_semantics<parallel>, #tpu.dimension_semantics<arbitrary>], iteration_bounds = array<i64: 1, 1, 1>, scalar_prefetch = 0 : i64, scratch_operands = 1 : i64, tpu.core_type = #tpu.core_type<tc>, window_params = [{transform_indices = @transform_0, window_bounds = array<i64: 16, 128>}, {transform_indices = @transform_1, window_bounds = array<i64: 128, 128>}, {transform_indices = @transform_2, window_bounds = array<i64: 1, 128>}, {transform_indices = @transform_3, window_bounds = array<i64: 16, 128>}]} {
    %c0_i32 = arith.constant 0 : i32
    %0 = arith.cmpi eq, %arg2, %c0_i32 : i32
    %1 = arith.extui %0 : i1 to i32
    %c0_i32_0 = arith.constant 0 : i32
    %2 = arith.cmpi ne, %1, %c0_i32_0 : i32
    scf.if %2 {
      %cst_10 = arith.constant 0.000000e+00 : f32
      %12 = vector.broadcast %cst_10 : f32 to vector<16x128xf32>
      %c0_11 = arith.constant 0 : index
      %c0_12 = arith.constant 0 : index
      %13 = vector.load %arg7[%c0_11, %c0_12] : memref<16x128xf32, #tpu.memory_space<vmem>>, vector<16x128xf32>
      tpu.vector_store %arg7[%c0_11, %c0_12], %12 {strides = array<i32>} : memref<16x128xf32, #tpu.memory_space<vmem>>, vector<16x128xf32>,
    } else {
    }
    %c0 = arith.constant 0 : index
    %c0_1 = arith.constant 0 : index
    %3 = vector.load %arg7[%c0, %c0_1] : memref<16x128xf32, #tpu.memory_space<vmem>>, vector<16x128xf32>
    %c0_2 = arith.constant 0 : index
    %c0_3 = arith.constant 0 : index
    %4 = vector.load %arg3[%c0_2, %c0_3] : memref<16x128xbf16, #tpu.memory_space<vmem>>, vector<16x128xbf16>
    %c0_4 = arith.constant 0 : index
    %c0_5 = arith.constant 0 : index
    %5 = vector.load %arg4[%c0_4, %c0_5] : memref<128x128xbf16, #tpu.memory_space<vmem>>, vector<128x128xbf16>
    %cst = arith.constant dense<0.000000e+00> : vector<16x128xf32>
    %6 = tpu.matmul %4, %5, %cst {dimension_numbers = #tpu.dot_dimension_numbers<[1], [0], [0], [1], [0, 0, 1, 1], [], []>} : vector<16x128xbf16>, vector<128x128xbf16>, vector<16x128xf32> -> vector<16x128xf32>
    %7 = arith.addf %3, %6 : vector<16x128xf32>
    %c0_6 = arith.constant 0 : index
    %c0_7 = arith.constant 0 : index
    %8 = vector.load %arg7[%c0_6, %c0_7] : memref<16x128xf32, #tpu.memory_space<vmem>>, vector<16x128xf32>
    tpu.vector_store %arg7[%c0_6, %c0_7], %7 {strides = array<i32>} : memref<16x128xf32, #tpu.memory_space<vmem>>, vector<16x128xf32>,
    %c0_i32_8 = arith.constant 0 : i32
    %9 = arith.cmpi eq, %arg2, %c0_i32_8 : i32
    %10 = arith.extui %9 : i1 to i32
    %c0_i32_9 = arith.constant 0 : i32
    %11 = arith.cmpi ne, %10, %c0_i32_9 : i32
    scf.if %11 {
      %c0_10 = arith.constant 0 : index
      %c0_11 = arith.constant 0 : index
      %12 = vector.load %arg7[%c0_10, %c0_11] : memref<16x128xf32, #tpu.memory_space<vmem>>, vector<16x128xf32>
      %c0_12 = arith.constant 0 : index
      %c0_13 = arith.constant 0 : index
      %13 = vector.load %arg5[%c0_12, %c0_13] : memref<1x128xf32, #tpu.memory_space<vmem>>, vector<1x128xf32>
      %14 = vector.broadcast %13 : vector<1x128xf32> to vector<16x128xf32>
      %15 = arith.addf %12, %14 : vector<16x128xf32>
      %c0_14 = arith.constant 0 : index
      %c0_15 = arith.constant 0 : index
      %16 = vector.load %arg6[%c0_14, %c0_15] : memref<16x128xf32, #tpu.memory_space<vmem>>, vector<16x128xf32>
      tpu.vector_store %arg6[%c0_14, %c0_15], %15 {strides = array<i32>} : memref<16x128xf32, #tpu.memory_space<vmem>>, vector<16x128xf32>,
    } else {
    }
    return
  }
  func.func @transform_0(%arg0: i32, %arg1: i32, %arg2: i32) -> (i32, i32) {
    %c0_i32 = arith.constant 0 : i32
    return %arg0, %arg2 : i32, i32
  }
  func.func @transform_1(%arg0: i32, %arg1: i32, %arg2: i32) -> (i32, i32) {
    %c0_i32 = arith.constant 0 : i32
    return %arg2, %arg1 : i32, i32
  }
  func.func @transform_2(%arg0: i32, %arg1: i32, %arg2: i32) -> (i32, i32) {
    %c0_i32 = arith.constant 0 : i32
    %c0_i32_0 = arith.constant 0 : i32
    return %c0_i32, %arg1 : i32, i32
  }
  func.func @transform_3(%arg0: i32, %arg1: i32, %arg2: i32) -> (i32, i32) {
    %c0_i32 = arith.constant 0 : i32
    return %arg0, %arg1 : i32, i32
  }
}

</mosaic_0001>

<bundles_post_ra>
// kernel: mlp_forward.3
= control target key start
LH: loop header
LB: loop body
LE: loop exit
PB: predicated region body
PF: predicated region fallthrough
CT: control target
= control target key end

     0   :  { %s237_s1 = inlined_call_operand.vmem [shape: bf16[128,128], index: 1, kind: input, shape index: {}]   ;;  %s238_s2 = inlined_call_operand.vmem [shape: f32[1,128], index: 2, kind: input, shape index: {}]   ;;  %s239_s0 = inlined_call_operand.vmem [shape: bf16[16,128], index: 0, kind: input, shape index: {}]   ;;  %s240_s3 = inlined_call_operand.vmem [shape: bf16[16,128], index: 3, kind: output, shape index: {}]  }
   0x1   :  { %v177_v0 = vld [vmem:[%s237_s1 + $0x38] sm:$0xff]  ;;  %v176_v1 = vld [vmem:[%s237_s1 + $0x30] sm:$0xff]  ;;  %v175_v2 = vld [vmem:[%s237_s1 + $0x28] sm:$0xff] }
   0x2   :  { %94 = vmatpush.bf16.msra.mxu0 %v177_v0  ;;  %v174_v3 = vld [vmem:[%s237_s1 + $0x20] sm:$0xff]  ;;  %v173_v4 = vld [vmem:[%s237_s1 + $0x18] sm:$0xff]  ;;  %v172_v5 = vld [vmem:[%s237_s1 + $0x10] sm:$0xff] }
   0x3   :  { %v171_v6 = vld [vmem:[%s237_s1 + $0x8] sm:$0xff]  ;;  %v170_v7 = vld [vmem:[%s237_s1] sm:$0xff] }
   0x4   :  { %v169_v8 = vld [vmem:[%s239_s0] sm:$0xff] }
   0x5   :  { %v183_v10 = vld [vmem:[%s238_s2] ss:$0 sm:$0xff] }
   0x6   :  { %95 = vmatpush.bf16.msra.mxu0 %v176_v1 }
   0xa   :  { %96 = vmatpush.bf16.msra.mxu0 %v175_v2 }
   0xe   :  { %97 = vmatpush.bf16.msra.mxu0 %v174_v3 }
  0x12   :  { %98 = vmatpush.bf16.msra.mxu0 %v173_v4 }
  0x16   :  { %99 = vmatpush.bf16.msra.mxu0 %v172_v5 }
  0x1a   :  { %100 = vmatpush.bf16.msra.mxu0 %v171_v6 }
  0x1e   :  { %101 = vmatpush.bf16.msra.mxu0 %v170_v7 }
  0x21   :  { %102 = vmatmul.bf16.vlgmr.msra.gmra.mxu0 %v169_v8 }
  0x9e   :  { %v103_v9 = vpop.f32.mrf.mxu0 }
  0x9f   :  { %v121_v11 = vadd.f32 %v183_v10, %v103_v9 }
  0xa1   :  { %v123_v14 = vmax.f32 %v121_v11, 0.0 }
  0xa6   :  { %v105_v12 = vpop.f32.mrf.mxu0 }
  0xa7   :  { %v122_v13 = vadd.f32 %v183_v10, %v105_v12 }
  0xa9   :  { %v124_v15 = vmax.f32 %v122_v13, 0.0 }
  0xab   :  { %v181_v16 = vpack.c.bf16 %v124_v15, %v123_v14 }
  0xad   :  { %182 = vst [vmem:[%s240_s3] sm:$0xff] %v181_v16  }

// kernel: mlp_forward.5
= control target key start
LH: loop header
LB: loop body
LE: loop exit
PB: predicated region body
PF: predicated region fallthrough
CT: control target
= control target key end

     0   :  { %s231_s1 = inlined_call_operand.vmem [shape: bf16[128,128], index: 1, kind: input, shape index: {}]   ;;  %s232_s2 = inlined_call_operand.vmem [shape: f32[1,128], index: 2, kind: input, shape index: {}]   ;;  %s233_s0 = inlined_call_operand.vmem [shape: bf16[16,128], index: 0, kind: input, shape index: {}]   ;;  %s234_s3 = inlined_call_operand.vmem [shape: f32[16,128], index: 3, kind: output, shape index: {}]  }
   0x1   :  { %v173_v0 = vld [vmem:[%s231_s1 + $0x38] sm:$0xff]  ;;  %v172_v1 = vld [vmem:[%s231_s1 + $0x30] sm:$0xff]  ;;  %v171_v2 = vld [vmem:[%s231_s1 + $0x28] sm:$0xff] }
   0x2   :  { %94 = vmatpush.bf16.msra.mxu0 %v173_v0  ;;  %v170_v3 = vld [vmem:[%s231_s1 + $0x20] sm:$0xff]  ;;  %v169_v4 = vld [vmem:[%s231_s1 + $0x18] sm:$0xff]  ;;  %v168_v5 = vld [vmem:[%s231_s1 + $0x10] sm:$0xff] }
   0x3   :  { %v167_v6 = vld [vmem:[%s231_s1 + $0x8] sm:$0xff]  ;;  %v166_v7 = vld [vmem:[%s231_s1] sm:$0xff] }
   0x4   :  { %v165_v8 = vld [vmem:[%s233_s0] sm:$0xff] }
   0x5   :  { %v174_v9 = vld [vmem:[%s232_s2] ss:$0 sm:$0xff] }
   0x6   :  { %95 = vmatpush.bf16.msra.mxu0 %v172_v1 }
   0xa   :  { %96 = vmatpush.bf16.msra.mxu0 %v171_v2 }
   0xe   :  { %97 = vmatpush.bf16.msra.mxu0 %v170_v3 }
  0x12   :  { %98 = vmatpush.bf16.msra.mxu0 %v169_v4 }
  0x16   :  { %99 = vmatpush.bf16.msra.mxu0 %v168_v5 }
  0x1a   :  { %100 = vmatpush.bf16.msra.mxu0 %v167_v6 }
  0x1e   :  { %101 = vmatpush.bf16.msra.mxu0 %v166_v7 }
  0x21   :  { %102 = vmatmul.bf16.vlgmr.msra.gmra.mxu0 %v165_v8 }
  0x9e   :  { %v103_v10 = vpop.f32.mrf.mxu0 }
  0x9f   :  { %v121_v11 = vadd.f32 %v174_v9, %v103_v10 }
  0xa1   :  { %123 = vst [vmem:[%s234_s3] sm:$0xff] %v121_v11 }
  0xa6   :  { %v105_v12 = vpop.f32.mrf.mxu0 }
  0xa7   :  { %v122_v13 = vadd.f32 %v174_v9, %v105_v12 }
  0xa9   :  { %124 = vst [vmem:[%s234_s3 + $0x8] sm:$0xff] %v122_v13 }

</bundles_post_ra>
